<compile_context>
chip_gen: v5e
topology: v5e:2x2
jax: 0.10.0
libtpu: 0.0.40
codegen_flags: <defaults>
</compile_context>

<pallas_src>
import jax
import jax.numpy as jnp
from jax.experimental import pallas as pl
from jax.experimental.pallas import tpu as pltpu


# ----------------------------------------------------------------------------
# Pallas kernels
# ----------------------------------------------------------------------------
def encoder_fused_kernel(obj_ref, img_ref, wmix_ref, style_ref,
                         ow_ref, ob_ref, rw_ref, rb_ref, iw_ref, ib_ref,
                         obj_out_ref, res_out_ref, feat_out_ref, h0_out_ref):
    # obj_vec = obj_pool @ W_obj + b_obj
    obj_vec = (
        jnp.dot(obj_ref[...].astype(jnp.bfloat16), ow_ref[...],
                preferred_element_type=jnp.float32)
        + ob_ref[...]
    )
    # res_vec = image_feat @ W_res + b_res
    res_vec = (
        jnp.dot(img_ref[...].astype(jnp.bfloat16), rw_ref[...],
                preferred_element_type=jnp.float32)
        + rb_ref[...]
    )
    # feat = obj_vec * w + res_vec * (1 - w)
    w = wmix_ref[...]                                   # (B, 1)
    feat = obj_vec * w + res_vec * (1.0 - w)
    # h0 = tanh(feat @ W_init + b_init + style_emb)
    h0 = jnp.tanh(
        jnp.dot(feat.astype(jnp.bfloat16), iw_ref[...],
                preferred_element_type=jnp.float32)
        + ib_ref[...] + style_ref[...]
    )
    obj_out_ref[...] = obj_vec
    res_out_ref[...] = res_vec
    feat_out_ref[...] = feat
    h0_out_ref[...] = h0


def matmul_bias_kernel(x_ref, w_ref, b_ref, o_ref):
    # y = x @ W + b   (bf16 MXU matmul, f32 accumulation, dtype of o_ref at rest)
    o_ref[...] = (
        jnp.dot(x_ref[...].astype(jnp.bfloat16), w_ref[...],
                preferred_element_type=jnp.float32)
        + b_ref[...]
    ).astype(o_ref.dtype)


def lstm_recurrence_kernel(gx_ref, h0_ref, wh_ref, h_out_ref, h_scr, c_scr):
    # gx_ref   : (tu, Bh, 4H) bf16  precomputed x @ Wx + b, lane-dense gate axis
    # h0_ref   : (Bh, H)      f32
    # wh_ref   : (H, 4H)      bf16  fused recurrent weights [i | f | g | o]
    # h_out_ref: (Bh, tu, H)  bf16  batch-major hidden-state sequence
    @pl.when(pl.program_id(1) == 0)
    def _():
        h_scr[...] = h0_ref[...]
        c_scr[...] = jnp.zeros_like(c_scr)

    tu = gx_ref.shape[0]          # static
    hidden = h_scr.shape[-1]      # static

    # Static Python unroll: tu <= 16 (enforced by wrapper); all slice offsets
    # are compile-time constants -> unmasked, static sublane/lane addressing.
    for s in range(tu):
        # ONE lane-dense matmul per timestep; wh_ref is consumed directly by
        # the dot (streams from VMEM, never hoisted into vregs).
        gates = (
            gx_ref[s].astype(jnp.float32)
            + jnp.dot(h_scr[...].astype(jnp.bfloat16), wh_ref[...],
                      preferred_element_type=jnp.float32)
        )
        i_g = jax.nn.sigmoid(gates[:, 0 * hidden:1 * hidden])
        f_g = jax.nn.sigmoid(gates[:, 1 * hidden:2 * hidden])
        g_g = jnp.tanh(gates[:, 2 * hidden:3 * hidden])
        o_g = jax.nn.sigmoid(gates[:, 3 * hidden:4 * hidden])
        c_new = f_g * c_scr[...] + i_g * g_g
        h_new = o_g * jnp.tanh(c_new)
        c_scr[...] = c_new
        h_scr[...] = h_new
        h_out_ref[:, s, :] = h_new.astype(h_out_ref.dtype)


# ----------------------------------------------------------------------------
# Pallas wrappers
# ----------------------------------------------------------------------------
def _fit_tile(dim, pref, quantum):
    # Full extent if it fits, otherwise the hardware-aligned preferred tile.
    # Edge blocks are handled by a cdiv grid (never the full-dim fallback).
    if dim <= pref:
        return dim
    return max(quantum, (pref // quantum) * quantum)


def pallas_encoder_fused(obj_pool, image_feat, w_obj, style_vec,
                         ow, ob, rw, rb, iw, ib):
    B, E = obj_pool.shape
    R = image_feat.shape[1]
    H = ow.shape[1]

    def full(shape):
        return pl.BlockSpec(shape, lambda i: (0,) * len(shape))

    return pl.pallas_call(
        encoder_fused_kernel,
        out_shape=tuple(jax.ShapeDtypeStruct((B, H), jnp.float32)
                        for _ in range(4)),
        grid=(1,),
        in_specs=[
            full((B, E)), full((B, R)), full((B, 1)), full((B, H)),
            full((E, H)), full((1, H)),
            full((R, H)), full((1, H)),
            full((H, H)), full((1, H)),
        ],
        out_specs=[full((B, H))] * 4,
        compiler_params=pltpu.CompilerParams(
            dimension_semantics=("arbitrary",)),
    )(obj_pool, image_feat, w_obj, style_vec, ow, ob, rw, rb, iw, ib)


def pallas_matmul_bias(x, w, b, *, out_dtype=jnp.float32, tm=256, tn=512):
    # y = x @ w + b, tiled over (M, N) with a cdiv grid; K kept whole.
    M, K = x.shape
    N = w.shape[1]
    tm = _fit_tile(M, tm, 8)
    tn = _fit_tile(N, tn, 128)
    grid = (pl.cdiv(M, tm), pl.cdiv(N, tn))

    x_b = jnp.dtype(x.dtype).itemsize
    w_b = jnp.dtype(w.dtype).itemsize
    o_b = jnp.dtype(out_dtype).itemsize
    tile_bytes = tm * K * x_b + K * tn * w_b + tn * 4 + tm * tn * o_b
    # double-buffered tiles + headroom, capped at 40 MiB (safe on v7x 64 MiB)
    vmem_limit = int(min(max(2 * tile_bytes + (2 << 20), 16 << 20), 40 << 20))

    flops = 2 * M * N * K
    bytes_accessed = x_b * M * K + w_b * K * N + 4 * N + o_b * M * N
    return pl.pallas_call(
        matmul_bias_kernel,
        out_shape=jax.ShapeDtypeStruct((M, N), out_dtype),
        grid=grid,
        in_specs=[
            pl.BlockSpec((tm, K), lambda i, j: (i, 0)),
            pl.BlockSpec((K, tn), lambda i, j: (0, j)),
            pl.BlockSpec((1, tn), lambda i, j: (0, j)),
        ],
        out_specs=pl.BlockSpec((tm, tn), lambda i, j: (i, j)),
        compiler_params=pltpu.CompilerParams(
            dimension_semantics=("parallel", "parallel"),
            vmem_limit_bytes=vmem_limit),
        cost_estimate=pl.CostEstimate(
            flops=flops, transcendentals=0, bytes_accessed=bytes_accessed),
    )(x, w, b)


def pallas_lstm_recurrence(gates_x, h0, wh):
    # gates_x : (T-1, B, 4H) bf16 time-major, lane-dense gate axis
    # h0      : (B, H) f32, wh : (H, 4H) bf16
    # returns : (B, T-1, H) bf16 batch-major (vocab GEMM needs no transpose)
    Tm1, B, H4 = gates_x.shape
    H = H4 // 4

    # Split the batch across v7x's 2 TensorCores only when both halves keep
    # sublane-aligned (multiple-of-8) tiles; otherwise run single-core.
    nb = 2 if (B % 2 == 0 and (B // 2) % 8 == 0) else 1
    Bh = B // nb

    # timesteps per grid step: sublane-aligned (16) or the full extent
    tu = Tm1 if Tm1 <= 16 else 16
    nt = pl.cdiv(Tm1, tu)

    # explicit scoped-VMEM budget (v5e defaults to only 16 MiB)
    vmem_bytes = (2 * H * H4 * 2            # wh (double-buffered, bf16)
                  + 2 * tu * Bh * H4 * 2    # gx blocks
                  + 2 * Bh * H * 4          # h0 blocks
                  + 2 * Bh * tu * H * 2     # h_out blocks
                  + 2 * Bh * H * 4)         # h/c scratch
    vmem_limit = int(min(max(2 * vmem_bytes + (2 << 20), 16 << 20), 100 << 20))

    return pl.pallas_call(
        lstm_recurrence_kernel,
        out_shape=jax.ShapeDtypeStruct((B, Tm1, H), jnp.bfloat16),
        grid=(nb, nt),
        in_specs=[
            pl.BlockSpec((tu, Bh, H4), lambda b, t: (t, b, 0)),
            pl.BlockSpec((Bh, H), lambda b, t: (b, 0)),
            pl.BlockSpec((H, H4), lambda b, t: (0, 0)),
        ],
        out_specs=pl.BlockSpec((Bh, tu, H), lambda b, t: (b, t, 0)),
        scratch_shapes=[
            pltpu.VMEM((Bh, H), jnp.float32),   # h state
            pltpu.VMEM((Bh, H), jnp.float32),   # c state
        ],
        compiler_params=pltpu.CompilerParams(
            dimension_semantics=("parallel", "arbitrary"),
            vmem_limit_bytes=vmem_limit),
    )(gates_x, h0, wh)


# ----------------------------------------------------------------------------
# Model: parameter init + forward
# ----------------------------------------------------------------------------
def init_params(key, *, vocab, obj_vocab, embed, hidden, res_dim, num_styles):
    ks = jax.random.split(key, 12)
    s = 0.02
    f32, bf16 = jnp.float32, jnp.bfloat16
    return {
        # Objword_feat_encoder
        "obj_emb":   (jax.random.normal(ks[0], (obj_vocab, embed)) * s).astype(f32),
        "obj_w":     (jax.random.normal(ks[1], (embed, hidden)) * s).astype(bf16),
        "obj_b":     jnp.zeros((1, hidden), f32),
        # Resnet_feat_encoder
        "res_w":     (jax.random.normal(ks[2], (res_dim, hidden)) * s).astype(bf16),
        "res_b":     jnp.zeros((1, hidden), f32),
        # P_Decoder (LSTM weights fused per gate order i,f,g,o along the 4H axis;
        # when porting PyTorch weights: wx = W_ih.T, wh = W_hh.T, lstm_b = b_ih + b_hh)
        "word_emb":  (jax.random.normal(ks[3], (vocab, embed)) * s).astype(bf16),
        "style_emb": (jax.random.normal(ks[4], (num_styles, hidden)) * s).astype(f32),
        "init_w":    (jax.random.normal(ks[5], (hidden, hidden)) * s).astype(bf16),
        "init_b":    jnp.zeros((1, hidden), f32),
        "wx":        (jax.random.normal(ks[6], (embed, 4 * hidden)) * s).astype(bf16),
        "wh":        (jax.random.normal(ks[7], (hidden, 4 * hidden)) * s).astype(bf16),
        "lstm_b":    jnp.zeros((1, 4 * hidden), f32),
        "out_w":     (jax.random.normal(ks[8], (hidden, vocab)) * s).astype(bf16),
        "out_b":     jnp.zeros((1, vocab), f32),
    }


def forward(params, cap, cap_len, obj, obj_num, image_feat, style_label,
            rng_key):
    B, T = cap.shape
    H = params["wh"].shape[0]

    # ---- Objword_feat_encoder gather + mean pool (XLA gather) ----
    # TODO(synk): the original Objword_feat_encoder is called with obj only;
    # obj_num is not used, so padded slots are included in the mean pool.
    obj_e = jnp.take(params["obj_emb"], obj, axis=0)          # (B, N_obj, E)
    obj_pool = jnp.mean(obj_e, axis=1)                        # (B, E)

    # ---- style-dependent random mixing weights ----
    samples_style = jnp.where(style_label != 4, 1.0, 0.0)     # (B,)
    rand_bits = jax.random.randint(rng_key, (B,), 0, 2).astype(jnp.float32)
    # weight_feat_dict = {0: 0, 1: 1} (identity on the random draw)
    random_weight_obj = jnp.where(samples_style == 1.0, 1.0, rand_bits)
    w_obj = random_weight_obj[:, None].astype(jnp.float32)    # (B, 1)

    style_vec = jnp.take(params["style_emb"], style_label, axis=0)  # (B, H)

    # ---- fused encoder: obj/res linears + mix + h0, one kernel ----
    obj_vec, res_vec, feat_vec, h0 = pallas_encoder_fused(
        obj_pool, image_feat, w_obj, style_vec,
        params["obj_w"], params["obj_b"],
        params["res_w"], params["res_b"],
        params["init_w"], params["init_b"])

    # ---- P_Decoder on cap[:, :-1] ----
    Tm1 = T - 1
    cap_in = cap[:, :-1]                                      # (B, T-1)
    # time-major gather: transpose the tiny index matrix, not the embedding slab
    idx_tm = jnp.transpose(cap_in).reshape(-1)                # (T-1 * B,)
    x_flat = jnp.take(params["word_emb"], idx_tm, axis=0)     # (T-1 * B, E) bf16

    # input projection hoisted out of the recurrence: one MXU GEMM, bf16 at rest
    gates_flat = pallas_matmul_bias(x_flat, params["wx"], params["lstm_b"],
                                    out_dtype=jnp.bfloat16)
    gates_x = gates_flat.reshape(Tm1, B, 4 * H)               # no big transpose

    # sequential recurrence; emits h batch-major so nothing downstream transposes
    h_seq = pallas_lstm_recurrence(gates_x, h0, params["wh"])  # (B, T-1, H) bf16

    # vocab projection over the whole batch-major slab: one lane-dense GEMM
    logits_flat = pallas_matmul_bias(h_seq.reshape(B * Tm1, H),
                                     params["out_w"], params["out_b"],
                                     out_dtype=jnp.float32, tm=256, tn=1024)
    logit = logits_flat.reshape(B, Tm1, -1)                   # (B, T-1, V)
    # TODO(synk): cap_len - 1 is only used for pack_padded_sequence masking in
    # the loss; logits are returned unmasked for all T-1 steps here.

    return logit, obj_vec, res_vec, feat_vec


# ----------------------------------------------------------------------------
if __name__ == "__main__":
    B, T = 2, 8
    VOCAB, OBJ_VOCAB = 32, 16
    EMBED, HIDDEN = 32, 32
    RES_DIM = 64
    OBJ_NUM = 4
    NUM_STYLES = 5

    root = jax.random.PRNGKey(0)
    k_param, k_cap, k_obj, k_img, k_rand = jax.random.split(root, 5)

    params = init_params(k_param, vocab=VOCAB, obj_vocab=OBJ_VOCAB,
                         embed=EMBED, hidden=HIDDEN, res_dim=RES_DIM,
                         num_styles=NUM_STYLES)

    cap = jax.random.randint(k_cap, (B, T), 0, VOCAB, dtype=jnp.int32)
    cap_len = jnp.array([T, T - 2], dtype=jnp.int32)
    obj = jax.random.randint(k_obj, (B, OBJ_NUM), 0, OBJ_VOCAB,
                             dtype=jnp.int32)
    obj_num = jnp.array([4, 3], dtype=jnp.int32)
    image_feat = jax.random.normal(k_img, (B, RES_DIM), dtype=jnp.float32)
    style_label = jnp.array([4, 1], dtype=jnp.int32)

    logit, obj_vec, res_vec, feat_vec = forward(
        params, cap, cap_len, obj, obj_num, image_feat, style_label, k_rand)

    jax.block_until_ready((logit, obj_vec, res_vec, feat_vec))
    assert logit.shape == (B, T - 1, VOCAB)
    assert obj_vec.shape == (B, HIDDEN)
    assert res_vec.shape == (B, HIDDEN)
    assert feat_vec.shape == (B, HIDDEN)
    print("KERNEL_OK")
</pallas_src>

<mosaic_0001>
module attributes {stable_mosaic.version = 11 : i64} {
  func.func @encoder_fused_kernel(%arg0: i32, %arg1: memref<2x32xf32, #tpu.memory_space<vmem>>, %arg2: memref<2x64xf32, #tpu.memory_space<vmem>>, %arg3: memref<2x1xf32, #tpu.memory_space<vmem>>, %arg4: memref<2x32xf32, #tpu.memory_space<vmem>>, %arg5: memref<32x32xbf16, #tpu.memory_space<vmem>>, %arg6: memref<1x32xf32, #tpu.memory_space<vmem>>, %arg7: memref<64x32xbf16, #tpu.memory_space<vmem>>, %arg8: memref<1x32xf32, #tpu.memory_space<vmem>>, %arg9: memref<32x32xbf16, #tpu.memory_space<vmem>>, %arg10: memref<1x32xf32, #tpu.memory_space<vmem>>, %arg11: memref<2x32xf32, #tpu.memory_space<vmem>>, %arg12: memref<2x32xf32, #tpu.memory_space<vmem>>, %arg13: memref<2x32xf32, #tpu.memory_space<vmem>>, %arg14: memref<2x32xf32, #tpu.memory_space<vmem>>) attributes {dimension_semantics = [#tpu.dimension_semantics<arbitrary>], iteration_bounds = array<i64: 1>, scalar_prefetch = 0 : i64, scratch_operands = 0 : i64, tpu.core_type = #tpu.core_type<tc>, window_params = [{pipeline_mode = #tpu.pipeline_mode<synchronous>, transform_indices = @transform_0, window_bounds = array<i64: 2, 32>}, {pipeline_mode = #tpu.pipeline_mode<synchronous>, transform_indices = @transform_1, window_bounds = array<i64: 2, 64>}, {pipeline_mode = #tpu.pipeline_mode<synchronous>, transform_indices = @transform_2, window_bounds = array<i64: 2, 1>}, {pipeline_mode = #tpu.pipeline_mode<synchronous>, transform_indices = @transform_3, window_bounds = array<i64: 2, 32>}, {pipeline_mode = #tpu.pipeline_mode<synchronous>, transform_indices = @transform_4, window_bounds = array<i64: 32, 32>}, {pipeline_mode = #tpu.pipeline_mode<synchronous>, transform_indices = @transform_5, window_bounds = array<i64: 1, 32>}, {pipeline_mode = #tpu.pipeline_mode<synchronous>, transform_indices = @transform_6, window_bounds = array<i64: 64, 32>}, {pipeline_mode = #tpu.pipeline_mode<synchronous>, transform_indices = @transform_7, window_bounds = array<i64: 1, 32>}, {pipeline_mode = #tpu.pipeline_mode<synchronous>, transform_indices = @transform_8, window_bounds = array<i64: 32, 32>}, {pipeline_mode = #tpu.pipeline_mode<synchronous>, transform_indices = @transform_9, window_bounds = array<i64: 1, 32>}, {pipeline_mode = #tpu.pipeline_mode<synchronous>, transform_indices = @transform_10, window_bounds = array<i64: 2, 32>}, {pipeline_mode = #tpu.pipeline_mode<synchronous>, transform_indices = @transform_11, window_bounds = array<i64: 2, 32>}, {pipeline_mode = #tpu.pipeline_mode<synchronous>, transform_indices = @transform_12, window_bounds = array<i64: 2, 32>}, {pipeline_mode = #tpu.pipeline_mode<synchronous>, transform_indices = @transform_13, window_bounds = array<i64: 2, 32>}]} {
    %c0 = arith.constant 0 : index
    %c0_0 = arith.constant 0 : index
    %0 = vector.load %arg1[%c0, %c0_0] : memref<2x32xf32, #tpu.memory_space<vmem>>, vector<2x32xf32>
    %1 = arith.truncf %0 : vector<2x32xf32> to vector<2x32xbf16>
    %c0_1 = arith.constant 0 : index
    %c0_2 = arith.constant 0 : index
    %2 = vector.load %arg5[%c0_1, %c0_2] : memref<32x32xbf16, #tpu.memory_space<vmem>>, vector<32x32xbf16>
    %cst = arith.constant dense<0.000000e+00> : vector<2x32xf32>
    %3 = tpu.matmul %1, %2, %cst {dimension_numbers = #tpu.dot_dimension_numbers<[1], [0], [0], [1], [0, 0, 1, 1], [], []>} : vector<2x32xbf16>, vector<32x32xbf16>, vector<2x32xf32> -> vector<2x32xf32>
    %c0_3 = arith.constant 0 : index
    %c0_4 = arith.constant 0 : index
    %4 = vector.load %arg6[%c0_3, %c0_4] : memref<1x32xf32, #tpu.memory_space<vmem>>, vector<1x32xf32>
    %5 = vector.broadcast %4 : vector<1x32xf32> to vector<2x32xf32>
    %6 = arith.addf %3, %5 : vector<2x32xf32>
    %c0_5 = arith.constant 0 : index
    %c0_6 = arith.constant 0 : index
    %7 = vector.load %arg2[%c0_5, %c0_6] : memref<2x64xf32, #tpu.memory_space<vmem>>, vector<2x64xf32>
    %8 = arith.truncf %7 : vector<2x64xf32> to vector<2x64xbf16>
    %c0_7 = arith.constant 0 : index
    %c0_8 = arith.constant 0 : index
    %9 = vector.load %arg7[%c0_7, %c0_8] : memref<64x32xbf16, #tpu.memory_space<vmem>>, vector<64x32xbf16>
    %cst_9 = arith.constant dense<0.000000e+00> : vector<2x32xf32>
    %10 = tpu.matmul %8, %9, %cst_9 {dimension_numbers = #tpu.dot_dimension_numbers<[1], [0], [0], [1], [0, 0, 1, 1], [], []>} : vector<2x64xbf16>, vector<64x32xbf16>, vector<2x32xf32> -> vector<2x32xf32>
    %c0_10 = arith.constant 0 : index
    %c0_11 = arith.constant 0 : index
    %11 = vector.load %arg8[%c0_10, %c0_11] : memref<1x32xf32, #tpu.memory_space<vmem>>, vector<1x32xf32>
    %12 = vector.broadcast %11 : vector<1x32xf32> to vector<2x32xf32>
    %13 = arith.addf %10, %12 : vector<2x32xf32>
    %c0_12 = arith.constant 0 : index
    %c0_13 = arith.constant 0 : index
    %14 = vector.load %arg3[%c0_12, %c0_13] : memref<2x1xf32, #tpu.memory_space<vmem>>, vector<2x1xf32>
    %15 = vector.broadcast %14 : vector<2x1xf32> to vector<2x32xf32>
    %16 = arith.mulf %6, %15 : vector<2x32xf32>
    %cst_14 = arith.constant 1.000000e+00 : f32
    %17 = vector.broadcast %cst_14 : f32 to vector<2x1xf32>
    %18 = arith.subf %17, %14 : vector<2x1xf32>
    %19 = vector.broadcast %18 : vector<2x1xf32> to vector<2x32xf32>
    %20 = arith.mulf %13, %19 : vector<2x32xf32>
    %21 = arith.addf %16, %20 : vector<2x32xf32>
    %22 = arith.truncf %21 : vector<2x32xf32> to vector<2x32xbf16>
    %c0_15 = arith.constant 0 : index
    %c0_16 = arith.constant 0 : index
    %23 = vector.load %arg9[%c0_15, %c0_16] : memref<32x32xbf16, #tpu.memory_space<vmem>>, vector<32x32xbf16>
    %cst_17 = arith.constant dense<0.000000e+00> : vector<2x32xf32>
    %24 = tpu.matmul %22, %23, %cst_17 {dimension_numbers = #tpu.dot_dimension_numbers<[1], [0], [0], [1], [0, 0, 1, 1], [], []>} : vector<2x32xbf16>, vector<32x32xbf16>, vector<2x32xf32> -> vector<2x32xf32>
    %c0_18 = arith.constant 0 : index
    %c0_19 = arith.constant 0 : index
    %25 = vector.load %arg10[%c0_18, %c0_19] : memref<1x32xf32, #tpu.memory_space<vmem>>, vector<1x32xf32>
    %26 = vector.broadcast %25 : vector<1x32xf32> to vector<2x32xf32>
    %27 = arith.addf %24, %26 : vector<2x32xf32>
    %c0_20 = arith.constant 0 : index
    %c0_21 = arith.constant 0 : index
    %28 = vector.load %arg4[%c0_20, %c0_21] : memref<2x32xf32, #tpu.memory_space<vmem>>, vector<2x32xf32>
    %29 = arith.addf %27, %28 : vector<2x32xf32>
    %30 = math.tanh %29 : vector<2x32xf32>
    %c0_22 = arith.constant 0 : index
    %c0_23 = arith.constant 0 : index
    %31 = vector.load %arg11[%c0_22, %c0_23] : memref<2x32xf32, #tpu.memory_space<vmem>>, vector<2x32xf32>
    tpu.vector_store %arg11[%c0_22, %c0_23], %6 {strides = array<i32>} : memref<2x32xf32, #tpu.memory_space<vmem>>, vector<2x32xf32>,
    %c0_24 = arith.constant 0 : index
    %c0_25 = arith.constant 0 : index
    %32 = vector.load %arg12[%c0_24, %c0_25] : memref<2x32xf32, #tpu.memory_space<vmem>>, vector<2x32xf32>
    tpu.vector_store %arg12[%c0_24, %c0_25], %13 {strides = array<i32>} : memref<2x32xf32, #tpu.memory_space<vmem>>, vector<2x32xf32>,
    %c0_26 = arith.constant 0 : index
    %c0_27 = arith.constant 0 : index
    %33 = vector.load %arg13[%c0_26, %c0_27] : memref<2x32xf32, #tpu.memory_space<vmem>>, vector<2x32xf32>
    tpu.vector_store %arg13[%c0_26, %c0_27], %21 {strides = array<i32>} : memref<2x32xf32, #tpu.memory_space<vmem>>, vector<2x32xf32>,
    %c0_28 = arith.constant 0 : index
    %c0_29 = arith.constant 0 : index
    %34 = vector.load %arg14[%c0_28, %c0_29] : memref<2x32xf32, #tpu.memory_space<vmem>>, vector<2x32xf32>
    tpu.vector_store %arg14[%c0_28, %c0_29], %30 {strides = array<i32>} : memref<2x32xf32, #tpu.memory_space<vmem>>, vector<2x32xf32>,
    return
  }
  func.func @transform_0(%arg0: i32) -> (i32, i32) {
    %c0_i32 = arith.constant 0 : i32
    %c0_i32_0 = arith.constant 0 : i32
    %c0_i32_1 = arith.constant 0 : i32
    return %c0_i32, %c0_i32_0 : i32, i32
  }
  func.func @transform_1(%arg0: i32) -> (i32, i32) {
    %c0_i32 = arith.constant 0 : i32
    %c0_i32_0 = arith.constant 0 : i32
    %c0_i32_1 = arith.constant 0 : i32
    return %c0_i32, %c0_i32_0 : i32, i32
  }
  func.func @transform_2(%arg0: i32) -> (i32, i32) {
    %c0_i32 = arith.constant 0 : i32
    %c0_i32_0 = arith.constant 0 : i32
    %c0_i32_1 = arith.constant 0 : i32
    return %c0_i32, %c0_i32_0 : i32, i32
  }
  func.func @transform_3(%arg0: i32) -> (i32, i32) {
    %c0_i32 = arith.constant 0 : i32
    %c0_i32_0 = arith.constant 0 : i32
    %c0_i32_1 = arith.constant 0 : i32
    return %c0_i32, %c0_i32_0 : i32, i32
  }
  func.func @transform_4(%arg0: i32) -> (i32, i32) {
    %c0_i32 = arith.constant 0 : i32
    %c0_i32_0 = arith.constant 0 : i32
    %c0_i32_1 = arith.constant 0 : i32
    return %c0_i32, %c0_i32_0 : i32, i32
  }
  func.func @transform_5(%arg0: i32) -> (i32, i32) {
    %c0_i32 = arith.constant 0 : i32
    %c0_i32_0 = arith.constant 0 : i32
    %c0_i32_1 = arith.constant 0 : i32
    return %c0_i32, %c0_i32_0 : i32, i32
  }
  func.func @transform_6(%arg0: i32) -> (i32, i32) {
    %c0_i32 = arith.constant 0 : i32
    %c0_i32_0 = arith.constant 0 : i32
    %c0_i32_1 = arith.constant 0 : i32
    return %c0_i32, %c0_i32_0 : i32, i32
  }
  func.func @transform_7(%arg0: i32) -> (i32, i32) {
    %c0_i32 = arith.constant 0 : i32
    %c0_i32_0 = arith.constant 0 : i32
    %c0_i32_1 = arith.constant 0 : i32
    return %c0_i32, %c0_i32_0 : i32, i32
  }
  func.func @transform_8(%arg0: i32) -> (i32, i32) {
    %c0_i32 = arith.constant 0 : i32
    %c0_i32_0 = arith.constant 0 : i32
    %c0_i32_1 = arith.constant 0 : i32
    return %c0_i32, %c0_i32_0 : i32, i32
  }
  func.func @transform_9(%arg0: i32) -> (i32, i32) {
    %c0_i32 = arith.constant 0 : i32
    %c0_i32_0 = arith.constant 0 : i32
    %c0_i32_1 = arith.constant 0 : i32
    return %c0_i32, %c0_i32_0 : i32, i32
  }
  func.func @transform_10(%arg0: i32) -> (i32, i32) {
    %c0_i32 = arith.constant 0 : i32
    %c0_i32_0 = arith.constant 0 : i32
    %c0_i32_1 = arith.constant 0 : i32
    return %c0_i32, %c0_i32_0 : i32, i32
  }
  func.func @transform_11(%arg0: i32) -> (i32, i32) {
    %c0_i32 = arith.constant 0 : i32
    %c0_i32_0 = arith.constant 0 : i32
    %c0_i32_1 = arith.constant 0 : i32
    return %c0_i32, %c0_i32_0 : i32, i32
  }
  func.func @transform_12(%arg0: i32) -> (i32, i32) {
    %c0_i32 = arith.constant 0 : i32
    %c0_i32_0 = arith.constant 0 : i32
    %c0_i32_1 = arith.constant 0 : i32
    return %c0_i32, %c0_i32_0 : i32, i32
  }
  func.func @transform_13(%arg0: i32) -> (i32, i32) {
    %c0_i32 = arith.constant 0 : i32
    %c0_i32_0 = arith.constant 0 : i32
    %c0_i32_1 = arith.constant 0 : i32
    return %c0_i32, %c0_i32_0 : i32, i32
  }
}

</mosaic_0001>

<bundles_post_ra>
// kernel: tpu_custom_call.1
= control target key start
LH: loop header
LB: loop body
LE: loop exit
PB: predicated region body
PF: predicated region fallthrough
CT: control target
= control target key end

     0   :  { %19 = vsyncpa [#allocation3], 0  ;;  %s554_s0 = inlined_call_operand.vmem [shape: f32[2,32], index: 0, kind: input, shape index: {}]   ;;  %s555_s1 = inlined_call_operand.vmem [shape: f32[2,64], index: 1, kind: input, shape index: {}]   ;;  %s556_s2 = inlined_call_operand.vmem [shape: f32[2,1], index: 2, kind: input, shape index: {}]   ;;  %s557_s3 = inlined_call_operand.vmem [shape: f32[2,32], index: 3, kind: input, shape index: {}]   ;;  %s558_s4 = inlined_call_operand.vmem [shape: bf16[32,32], index: 4, kind: input, shape index: {}]   ;;  %s559_s5 = inlined_call_operand.vmem [shape: f32[1,32], index: 5, kind: input, shape index: {}]   ;;  %s560_s6 = inlined_call_operand.vmem [shape: bf16[64,32], index: 6, kind: input, shape index: {}]   ;;  %s561_s7 = inlined_call_operand.vmem [shape: f32[1,32], index: 7, kind: input, shape index: {}]   ;;  %s562_s8 = inlined_call_operand.vmem [shape: bf16[32,32], index: 8, kind: input, shape index: {}]   ;;  %s563_s9 = inlined_call_operand.vmem [shape: f32[1,32], index: 9, kind: input, shape index: {}]   ;;  %s564_s10 = inlined_call_operand.hbm [shape: f32[2,32], index: 10, kind: output, shape index: {0}]   ;;  %s565_s11 = inlined_call_operand.hbm [shape: f32[2,32], index: 11, kind: output, shape index: {1}]   ;;  %s566_s12 = inlined_call_operand.hbm [shape: f32[2,32], index: 12, kind: output, shape index: {2}]   ;;  %s567_s13 = inlined_call_operand.hbm [shape: f32[2,32], index: 13, kind: output, shape index: {3}]  }
   0x1   :  { %20 = vsyncpa [#allocation5], 0  ;;  %v296_v0 = vld [vmem:[%s558_s4 + $0x8] sm:$0xff]  ;;  %v300_v1 = vld [vmem:[%s560_s6 + $0x18] sm:$0xff]  ;;  %v416_v3 = vmov 0  }
   0x2   :  { %v295_v2 = vld [vmem:[%s558_s4] sm:$0xff]  ;;  %308 = vset.pattern.permute.xlu0 %v416_v3  ;;  %75 = vmatpush.bf16.msra.mxu0 %v296_v0  ;;  %v299_v4 = vld [vmem:[%s560_s6 + $0x10] sm:$0xff] }
   0x3   :  { %128 = vmatpush.bf16.msra.mxu1 %v300_v1  ;;  %v43_v5 = vld [vmem:[%s554_s0] sm:$0x3] }
   0x4   :  { %v137_v6 = vld [vmem:[%s556_s2] sm:$0x3] }
   0x5   :  { %140 = vperm.xlu0 %308, %v137_v6  }
   0x6   :  { %21 = vsyncpa [#allocation8], 0  ;;  %v44_v7 = vpack.c.bf16 %v43_v5, %v43_v5  ;;  %76 = vmatpush.bf16.msra.mxu0 %v295_v2  ;;  %vm65_vm0 = vcmask 261120   ;;  %v298_v8 = vld [vmem:[%s560_s6 + $0x8] sm:$0xff]  ;;  %v144_v9 = vsub.f32 1.0, %v137_v6  ;;  %v297_v10 = vld [vmem:[%s560_s6] sm:$0xff] }
   0x7   :  { %129 = vmatpush.bf16.msra.mxu1 %v299_v4  ;;  %v82_v11 = vld [vmem:[%s555_s1] sm:$0x3]  ;;  %vm120_vm1 = vcmask 523264   ;;  %v302_v13 = vld [vmem:[%s562_s8 + $0x8] sm:$0xff]  ;;  %vm192_vm2 = vcmask 254976   ;;  %s215_s29 = sshll.u32 %s565_s11, 4  ;;  %s216_s29 = int_to_ptr.hbm [resolvable:$true] %s215_s29 }
   0x8   :  { %v83_v12 = vpack.c.bf16 %v82_v11, %v82_v11  ;;  %182 = vmatpush.bf16.msra.mxu2 %v302_v13  ;;  %v301_v14 = vld [vmem:[%s562_s8] sm:$0xff]  ;;  %s418_s14 = smov [#allocation2]   ;;  %s204_s18 = sshll.u32 %s564_s10, 4  ;;  %s205_s18 = int_to_ptr.hbm [resolvable:$true] %s204_s18 }
   0x9   :  { %268 = vmatmul.msk.bf16.vlgmr.msra.gmra.mxu0 %vm65_vm0, %v44_v7  ;;  %v309_v15 = vld [vmem:[%s559_s5] ss:$0 sm:$0xff]  ;;  %s202_s15 = sshll.u32 %s418_s14, 4  ;;  %s226_s20 = sshll.u32 %s566_s12, 4  ;;  %s203_s15 = int_to_ptr.vmem [resolvable:$true] %s202_s15  ;;  %s227_s20 = int_to_ptr.hbm [resolvable:$true] %s226_s20 }
   0xa   :  { %v310_v19 = vld [vmem:[%s561_s7] ss:$0 sm:$0xff]  ;;  %s417_s7 = smov [#allocation4]   ;;  %s419_s21 = smov [#allocation6]  }
   0xb   :  { %130 = vmatpush.bf16.msra.mxu1 %v298_v8  ;;  %s213_s30 = sshll.u32 %s417_s7, 4  ;;  %s224_s11 = sshll.u32 %s419_s21, 4  ;;  %v311_v29 = vld [vmem:[%s563_s9] ss:$0 sm:$0xff]  ;;  %s214_s30 = int_to_ptr.vmem [resolvable:$true] %s213_s30  ;;  %s225_s11 = int_to_ptr.vmem [resolvable:$true] %s224_s11 }
   0xc   :  { %183 = vmatpush.bf16.msra.mxu2 %v301_v14  ;;  %v189_v31 = vld [vmem:[%s557_s3] sm:$0x3]  ;;  %s420_s10 = smov [#allocation7]   ;;  %s237_s26 = sshll.u32 %s567_s13, 4  ;;  %s238_s26 = int_to_ptr.hbm [resolvable:$true] %s237_s26 }
   0xd   :  { %147 = vperm.xlu0 %308, %v144_v9   ;;  %s235_s24 = sshll.u32 %s420_s10, 4  ;;  %s236_s24 = int_to_ptr.vmem [resolvable:$true] %s235_s24 }
   0xf   :  { %131 = vmatpush.bf16.msra.mxu1 %v297_v10 }
  0x12   :  { %285 = vmatmul.msk.bf16.vlgmr.msra.gmra.mxu1 %vm120_vm1, %v83_v12 }
  0x77   :  { %v141_v16 = vpop.permute.xlu0 %140 }
  0x7f   :  { %v148_v23 = vpop.permute.xlu0 %147 }
  0x86   :  { %v78_v17 = vpop.f32.mrf.mxu0 }
  0x87   :  { %v79_v18 = vadd.f32 %v309_v15, %v78_v17 }
  0x89   :  { %193 = vst.msk [vmem:[#allocation2] sm:$0x3] %vm192_vm2, %v79_v18  ;;  %v143_v24 = vmul.f32 %v141_v16, %v79_v18 }
  0x8a   :  { %207 = dma.vmem_to_hbm [thread:$0]  %s203_s15, 32, %s205_s18, [#allocation3]  }
  0x8e   :  { %v80_v20 = vpop.f32.mrf.mxu0 }
  0x8f   :  { %v133_v21 = vpop.f32.mrf.mxu1 }
  0x90   :  { %v134_v22 = vadd.f32 %v310_v19, %v133_v21 }
  0x92   :  { %v150_v25 = vmul.f32 %v148_v23, %v134_v22  ;;  %194 = vst.msk [vmem:[#allocation4] sm:$0x3] %vm192_vm2, %v134_v22 }
  0x93   :  { %218 = dma.vmem_to_hbm [thread:$0]  %s214_s30, 32, %s216_s29, [#allocation5]  }
  0x94   :  { %v151_v26 = vadd.f32 %v150_v25, %v143_v24 }
  0x96   :  { %v152_v27 = vpack.c.bf16 %v151_v26, %v151_v26  ;;  %195 = vst.msk [vmem:[#allocation6] sm:$0x3] %vm192_vm2, %v151_v26 }
  0x97   :  { %v135_v28 = vpop.f32.mrf.mxu1  ;;  %229 = dma.vmem_to_hbm [thread:$0]  %s225_s11, 32, %s227_s20, [#allocation5]  }
  0x98   :  { %294 = vmatmul.msk.bf16.vlgmr.msra.gmra.mxu2 %vm65_vm0, %v152_v27 }
 0x11b   :  { %v185_v30 = vpop.f32.mrf.mxu2 }
 0x11c   :  { %v186_v32 = vadd.f32 %v311_v29, %v185_v30 }
 0x11e   :  { %v190_v33 = vadd.f32 %v189_v31, %v186_v32 }
 0x120   :  { %312 = vtanh.f32 %v190_v33 }
 0x123   :  { %v187_v34 = vpop.f32.mrf.mxu2 }
 0x126   :  { %v313_v35 = vpop.eup %312 }
 0x127   :  { %196 = vst.msk [vmem:[#allocation7] sm:$0x3] %vm192_vm2, %v313_v35 }
 0x128   :  { %240 = dma.vmem_to_hbm [thread:$0]  %s236_s24, 32, %s238_s26, [#allocation8]  }
 0x129   :  { %410 = dma.done.wait [#allocation3], 32  }
 0x12a   :  { %411 = vsyncadd [#allocation3], 4294967264 }
 0x12b   :  { %412 = dma.done.wait [#allocation5], 64  }
 0x12c   :  { %413 = vsyncadd [#allocation5], 4294967232 }
 0x12d   :  { %414 = dma.done.wait [#allocation8], 32  }
 0x12e   :  { %415 = vsyncadd [#allocation8], 4294967264 }
 0x12f   :  { %257 = vsyncpa [#allocation3], 1 }
 0x130   :  { %258 = vsyncpa [#allocation5], 1 }
 0x131   :  { %259 = vsyncpa [#allocation8], 1 }

</bundles_post_ra>
